<compile_context>
chip_gen: v7x
topology: tpu7x:2x2x1
jax: 0.10.0
libtpu: 0.0.40
codegen_flags: <defaults>
</compile_context>

<pallas_src>
import functools

import jax
import jax.numpy as jnp
from jax import lax
from jax.experimental import pallas as pl
from jax.experimental.pallas import tpu as pltpu


# ------------------------- model dimensions (small, synthetic) ----------------
B = 2          # batch
S = 8          # sequence length
H = 32         # hidden size
FF = 4 * H     # FFN inner size
V = 100        # vocab size
N_TYPES = 2    # token-type vocab
HC = 32        # contextual teacher embedding dim
HS = 32        # structural teacher embedding dim


# ------------------------- fused Pallas kernel --------------------------------
def student_kernel(x_ref, mask_ref, wqkvo_ref, ln_ref, w1_ref, b1_ref,
                   w2_ref, b2_ref, wcs_ref, ctx_ref, struct_ref,
                   emb_ref, loss_ref):
    """Encoder layer + masked mean pooling + structural/contextual head, whole batch."""
    x = x_ref[...].astype(jnp.float32)            # [B, S, H]
    m = mask_ref[...].astype(jnp.float32)         # [B, 1, S]  (1.0 = real token), lane-aligned
    x2 = x.reshape(B * S, H)                      # [B*S, H]

    # --- fused QKV projection (single MXU matmul on the packed [H, 4H] weight) ---
    wqkvo = wqkvo_ref[...]                        # [H, 4H] = q | k | v | o
    qkv = jnp.dot(x2, wqkvo[:, :3 * H], preferred_element_type=jnp.float32)   # [B*S, 3H]
    qkv = qkv.reshape(B, S, 3 * H)
    q = qkv[:, :, :H]
    k = qkv[:, :, H:2 * H]
    v = qkv[:, :, 2 * H:]

    # --- single-head self attention (batched) ---
    scale = jnp.float32(1.0 / (H ** 0.5))
    scores = jnp.einsum('bqd,bkd->bqk', q, k,
                        preferred_element_type=jnp.float32) * scale           # [B, S, S]
    scores = scores + (1.0 - m) * jnp.float32(-1e9)    # mask keys ([B,1,S] broadcasts over q)
    probs = jax.nn.softmax(scores, axis=-1)
    attn = jnp.einsum('bqk,bkd->bqd', probs, v,
                      preferred_element_type=jnp.float32)                     # [B, S, H]
    attn_out = jnp.dot(attn.reshape(B * S, H), wqkvo[:, 3 * H:],
                       preferred_element_type=jnp.float32)                    # [B*S, H]

    # --- residual + layernorm 1 ---
    h = x2 + attn_out
    g1 = ln_ref[0, 0]
    beta1 = ln_ref[0, 1]
    mu = jnp.mean(h, axis=-1, keepdims=True)
    var = jnp.mean((h - mu) * (h - mu), axis=-1, keepdims=True)
    h1 = (h - mu) * lax.rsqrt(var + 1e-5) * g1 + beta1

    # --- feed-forward ---
    inner = jnp.dot(h1, w1_ref[...], preferred_element_type=jnp.float32) + b1_ref[...]
    inner = jax.nn.gelu(inner)
    ffn = jnp.dot(inner, w2_ref[...], preferred_element_type=jnp.float32) + b2_ref[...]

    # --- residual + layernorm 2 ---
    h2 = h1 + ffn
    g2 = ln_ref[1, 0]
    beta2 = ln_ref[1, 1]
    mu2 = jnp.mean(h2, axis=-1, keepdims=True)
    var2 = jnp.mean((h2 - mu2) * (h2 - mu2), axis=-1, keepdims=True)
    h2n = (h2 - mu2) * lax.rsqrt(var2 + 1e-5) * g2 + beta2

    # --- masked mean pooling -> document embedding (done as a batched matmul) ---
    h3 = h2n.reshape(B, S, H)
    pooled = jnp.einsum('bks,bsh->bkh', m, h3,
                        preferred_element_type=jnp.float32)[:, 0, :]          # [B, H]
    denom = jnp.maximum(jnp.sum(m, axis=-1), jnp.float32(1.0))                # [B, 1]
    pooled = pooled * pl.reciprocal(denom, approx=True)
    emb_ref[...] = pooled.astype(emb_ref.dtype)

    # --- StructuralContextualHead (fused wc|ws projection) ---
    proj = jnp.dot(pooled, wcs_ref[...], preferred_element_type=jnp.float32)  # [B, HC+HS]
    proj_c = proj[:, :HC]
    proj_s = proj[:, HC:]

    # contextual branch: MSE against teacher contextual embedding
    dc = proj_c - ctx_ref[...].astype(jnp.float32)
    closs = jnp.mean(dc * dc, axis=-1, keepdims=True)                         # [B, 1]

    # structural branch: 1 - cosine similarity against structural embedding
    se = struct_ref[...].astype(jnp.float32)
    num = jnp.sum(proj_s * se, axis=-1, keepdims=True)
    ssp = jnp.sum(proj_s * proj_s, axis=-1, keepdims=True)
    sse = jnp.sum(se * se, axis=-1, keepdims=True)
    sloss = 1.0 - num * lax.rsqrt(ssp * sse + jnp.float32(1e-12))             # [B, 1]

    loss_ref[...] = jnp.concatenate([closs, sloss], axis=-1)                  # [B, 2]


# ------------------------- wrapper ---------------------------------------------
def run_student(x_emb, mask_f, contextual, structural, params):
    """x_emb: [B,S,H] f32, mask_f: [B,1,S] f32 -> (embedding [B,H], losses [B,2])."""
    emb, losses = pl.pallas_call(
        student_kernel,
        out_shape=(jax.ShapeDtypeStruct((B, H), jnp.float32),
                   jax.ShapeDtypeStruct((B, 2), jnp.float32)),
        grid_spec=pltpu.PrefetchScalarGridSpec(
            num_scalar_prefetch=0,
            grid=(1,),                                     # single invocation, whole batch
            in_specs=[
                pl.BlockSpec((B, S, H), lambda i: (0, 0, 0)),        # x_emb
                pl.BlockSpec((B, 1, S), lambda i: (0, 0, 0)),        # mask (lane-aligned)
                pl.BlockSpec((H, 4 * H), lambda i: (0, 0)),          # Wq|Wk|Wv|Wo packed
                pl.BlockSpec((2, 2, H), lambda i: (0, 0, 0)),        # LN params
                pl.BlockSpec((H, FF), lambda i: (0, 0)),             # W1
                pl.BlockSpec((1, FF), lambda i: (0, 0)),             # b1
                pl.BlockSpec((FF, H), lambda i: (0, 0)),             # W2
                pl.BlockSpec((1, H), lambda i: (0, 0)),              # b2
                pl.BlockSpec((H, HC + HS), lambda i: (0, 0)),        # Wc|Ws packed
                pl.BlockSpec((B, HC), lambda i: (0, 0)),             # contextual teacher
                pl.BlockSpec((B, HS), lambda i: (0, 0)),             # structural teacher
            ],
            out_specs=[
                pl.BlockSpec((B, H), lambda i: (0, 0)),              # pooled embedding
                pl.BlockSpec((B, 2), lambda i: (0, 0)),              # [closs, sloss]
            ],
        ),
        compiler_params=pltpu.CompilerParams(
            dimension_semantics=("arbitrary",)),
    )(x_emb, mask_f,
      params["wqkvo"], params["ln"],
      params["w1"], params["b1"], params["w2"], params["b2"],
      params["wcs"], contextual, structural)
    return emb, losses


def init_params(key):
    keys = jax.random.split(key, 8)
    scale = 0.02
    p = {
        "tok_emb": scale * jax.random.normal(keys[0], (V, H), jnp.float32),
        "pos_emb": scale * jax.random.normal(keys[1], (S, H), jnp.float32),
        "type_emb": scale * jax.random.normal(keys[2], (N_TYPES, H), jnp.float32),
        # packed attention weights: columns [0:H]=Wq, [H:2H]=Wk, [2H:3H]=Wv, [3H:4H]=Wo
        "wqkvo": scale * jax.random.normal(keys[3], (H, 4 * H), jnp.float32),
        # ln[layer, 0] = gamma, ln[layer, 1] = beta
        "ln": jnp.stack([jnp.stack([jnp.ones((H,)), jnp.zeros((H,))]),
                         jnp.stack([jnp.ones((H,)), jnp.zeros((H,))])]).astype(jnp.float32),
        "w1": scale * jax.random.normal(keys[4], (H, FF), jnp.float32),
        "b1": jnp.zeros((1, FF), jnp.float32),
        "w2": scale * jax.random.normal(keys[5], (FF, H), jnp.float32),
        "b2": jnp.zeros((1, H), jnp.float32),
        # packed head weights: columns [0:HC]=Wc (contextual), [HC:HC+HS]=Ws (structural)
        "wcs": scale * jax.random.normal(keys[6], (H, HC + HS), jnp.float32),
    }
    return p


@functools.partial(jax.jit, static_argnames=())
def student_forward(params, input_ids, attention_mask, token_type_ids,
                    structural_embed, contextual_embed, length):
    # --- embedding lookups (gathers) stay as JAX glue -------------------------
    x_emb = (params["tok_emb"][input_ids]
             + params["pos_emb"][None, :, :]
             + params["type_emb"][token_type_ids]).astype(jnp.float32)    # [B, S, H]
    mask_f = attention_mask.astype(jnp.float32)[:, None, :]               # [B, 1, S]

    # --- fused encoder + head in one Pallas call ------------------------------
    # TODO(synk): original head may gate per-sample losses on `length`; lengths
    # are accepted but not used here.
    embedding, losses = run_student(x_emb, mask_f, contextual_embed,
                                    structural_embed, params)

    outputs = {"embedding": embedding}
    outputs["contextual_loss"] = jnp.mean(losses[:, 0])
    outputs["structural_loss"] = jnp.mean(losses[:, 1])
    outputs["loss"] = outputs["contextual_loss"] + outputs["structural_loss"]
    return outputs


if __name__ == "__main__":
    key = jax.random.PRNGKey(0)
    pkey, k_ids, k_ctx, k_str = jax.random.split(key, 4)
    params = init_params(pkey)

    input_ids = jax.random.randint(k_ids, (B, S), 0, V, dtype=jnp.int32)
    # sample 0 uses all 8 tokens, sample 1 uses 5 (rest padded)
    attention_mask = jnp.array([[1] * 8, [1] * 5 + [0] * 3], dtype=jnp.int32)
    token_type_ids = jnp.zeros((B, S), dtype=jnp.int32)
    length = jnp.array([8, 5], dtype=jnp.int32)
    contextual_embed = jax.random.normal(k_ctx, (B, HC), jnp.float32)
    structural_embed = jax.random.normal(k_str, (B, HS), jnp.float32)

    out = student_forward(params, input_ids, attention_mask, token_type_ids,
                          structural_embed, contextual_embed, length)
    jax.block_until_ready(out)
    assert out["embedding"].shape == (B, H)
    assert out["loss"].shape == ()
    print("KERNEL_OK")
</pallas_src>

<mosaic_0001>
module attributes {stable_mosaic.version = 11 : i64} {
  func.func @student_kernel(%arg0: i32, %arg1: memref<2x8x32xf32, #tpu.memory_space<vmem>>, %arg2: memref<2x1x8xf32, #tpu.memory_space<vmem>>, %arg3: memref<32x128xf32, #tpu.memory_space<vmem>>, %arg4: memref<2x2x32xf32, #tpu.memory_space<vmem>>, %arg5: memref<32x128xf32, #tpu.memory_space<vmem>>, %arg6: memref<1x128xf32, #tpu.memory_space<vmem>>, %arg7: memref<128x32xf32, #tpu.memory_space<vmem>>, %arg8: memref<1x32xf32, #tpu.memory_space<vmem>>, %arg9: memref<32x64xf32, #tpu.memory_space<vmem>>, %arg10: memref<2x32xf32, #tpu.memory_space<vmem>>, %arg11: memref<2x32xf32, #tpu.memory_space<vmem>>, %arg12: memref<2x32xf32, #tpu.memory_space<vmem>>, %arg13: memref<2x2xf32, #tpu.memory_space<vmem>>) attributes {dimension_semantics = [#tpu.dimension_semantics<arbitrary>], iteration_bounds = array<i64: 1>, scalar_prefetch = 0 : i64, scratch_operands = 0 : i64, tpu.core_type = #tpu.core_type<tc>, window_params = [{pipeline_mode = #tpu.pipeline_mode<synchronous>, transform_indices = @transform_0, window_bounds = array<i64: 2, 8, 32>}, {pipeline_mode = #tpu.pipeline_mode<synchronous>, transform_indices = @transform_1, window_bounds = array<i64: 2, 1, 8>}, {pipeline_mode = #tpu.pipeline_mode<synchronous>, transform_indices = @transform_2, window_bounds = array<i64: 32, 128>}, {pipeline_mode = #tpu.pipeline_mode<synchronous>, transform_indices = @transform_3, window_bounds = array<i64: 2, 2, 32>}, {pipeline_mode = #tpu.pipeline_mode<synchronous>, transform_indices = @transform_4, window_bounds = array<i64: 32, 128>}, {pipeline_mode = #tpu.pipeline_mode<synchronous>, transform_indices = @transform_5, window_bounds = array<i64: 1, 128>}, {pipeline_mode = #tpu.pipeline_mode<synchronous>, transform_indices = @transform_6, window_bounds = array<i64: 128, 32>}, {pipeline_mode = #tpu.pipeline_mode<synchronous>, transform_indices = @transform_7, window_bounds = array<i64: 1, 32>}, {pipeline_mode = #tpu.pipeline_mode<synchronous>, transform_indices = @transform_8, window_bounds = array<i64: 32, 64>}, {pipeline_mode = #tpu.pipeline_mode<synchronous>, transform_indices = @transform_9, window_bounds = array<i64: 2, 32>}, {pipeline_mode = #tpu.pipeline_mode<synchronous>, transform_indices = @transform_10, window_bounds = array<i64: 2, 32>}, {pipeline_mode = #tpu.pipeline_mode<synchronous>, transform_indices = @transform_11, window_bounds = array<i64: 2, 32>}, {pipeline_mode = #tpu.pipeline_mode<synchronous>, transform_indices = @transform_12, window_bounds = array<i64: 2, 2>}]} {
    %c0 = arith.constant 0 : index
    %c0_0 = arith.constant 0 : index
    %c0_1 = arith.constant 0 : index
    %0 = vector.load %arg1[%c0, %c0_0, %c0_1] : memref<2x8x32xf32, #tpu.memory_space<vmem>>, vector<2x8x32xf32>
    %c0_2 = arith.constant 0 : index
    %c0_3 = arith.constant 0 : index
    %c0_4 = arith.constant 0 : index
    %1 = vector.load %arg2[%c0_2, %c0_3, %c0_4] : memref<2x1x8xf32, #tpu.memory_space<vmem>>, vector<2x1x8xf32>
    %2 = vector.shape_cast %0 : vector<2x8x32xf32> to vector<16x32xf32>
    %c0_5 = arith.constant 0 : index
    %c0_6 = arith.constant 0 : index
    %3 = vector.load %arg3[%c0_5, %c0_6] : memref<32x128xf32, #tpu.memory_space<vmem>>, vector<32x128xf32>
    %4 = vector.extract_strided_slice %3 {offsets = [0, 0], sizes = [32, 96], strides = [1, 1]} : vector<32x128xf32> to vector<32x96xf32>
    %cst = arith.constant dense<0.000000e+00> : vector<16x96xf32>
    %5 = tpu.matmul %2, %4, %cst {dimension_numbers = #tpu.dot_dimension_numbers<[1], [0], [0], [1], [0, 0, 1, 1], [], []>} : vector<16x32xf32>, vector<32x96xf32>, vector<16x96xf32> -> vector<16x96xf32>
    %6 = vector.shape_cast %5 : vector<16x96xf32> to vector<2x8x96xf32>
    %7 = vector.extract_strided_slice %6 {offsets = [0, 0, 0], sizes = [2, 8, 32], strides = [1, 1, 1]} : vector<2x8x96xf32> to vector<2x8x32xf32>
    %8 = vector.extract_strided_slice %6 {offsets = [0, 0, 32], sizes = [2, 8, 32], strides = [1, 1, 1]} : vector<2x8x96xf32> to vector<2x8x32xf32>
    %9 = vector.extract_strided_slice %6 {offsets = [0, 0, 64], sizes = [2, 8, 32], strides = [1, 1, 1]} : vector<2x8x96xf32> to vector<2x8x32xf32>
    "tpu.trace_start"() <{level = 10 : i32, message = "bqd,bkd->bqk"}> : () -> ()
    %cst_7 = arith.constant dense<0.000000e+00> : vector<2x8x8xf32>
    %10 = tpu.matmul %7, %8, %cst_7 {dimension_numbers = #tpu.dot_dimension_numbers<[2], [2], [1], [1], [0, 0, 0, 1, 1, 1], [0], [0]>} : vector<2x8x32xf32>, vector<2x8x32xf32>, vector<2x8x8xf32> -> vector<2x8x8xf32>
    "tpu.trace_stop"() : () -> ()
    %cst_8 = arith.constant 0.176776692 : f32
    %11 = vector.broadcast %cst_8 : f32 to vector<2x8x8xf32>
    %12 = arith.mulf %10, %11 : vector<2x8x8xf32>
    %cst_9 = arith.constant 1.000000e+00 : f32
    %13 = vector.broadcast %cst_9 : f32 to vector<2x1x8xf32>
    %14 = arith.subf %13, %1 : vector<2x1x8xf32>
    %cst_10 = arith.constant -1.000000e+09 : f32
    %15 = vector.broadcast %cst_10 : f32 to vector<2x1x8xf32>
    %16 = arith.mulf %14, %15 : vector<2x1x8xf32>
    %17 = vector.broadcast %16 : vector<2x1x8xf32> to vector<2x8x8xf32>
    %18 = arith.addf %12, %17 : vector<2x8x8xf32>
    %cst_11 = arith.constant dense<0xFF800000> : vector<2x8xf32>
    %19 = vector.multi_reduction <maximumf>, %18, %cst_11 [2] : vector<2x8x8xf32> to vector<2x8xf32>
    %cst_12 = arith.constant 0xFF800000 : f32
    %20 = vector.broadcast %cst_12 : f32 to vector<2x8xf32>
    %21 = arith.maximumf %20, %19 : vector<2x8xf32>
    %22 = vector.shape_cast %21 : vector<2x8xf32> to vector<2x8x1xf32>
    %23 = vector.broadcast %22 : vector<2x8x1xf32> to vector<2x8x8xf32>
    %24 = arith.subf %18, %23 : vector<2x8x8xf32>
    %25 = math.exp %24 : vector<2x8x8xf32>
    %cst_13 = arith.constant dense<0.000000e+00> : vector<2x8xf32>
    %26 = vector.multi_reduction <add>, %25, %cst_13 [2] : vector<2x8x8xf32> to vector<2x8xf32>
    %27 = vector.shape_cast %26 : vector<2x8xf32> to vector<2x8x1xf32>
    %28 = vector.broadcast %27 : vector<2x8x1xf32> to vector<2x8x8xf32>
    %29 = arith.divf %25, %28 : vector<2x8x8xf32>
    "tpu.trace_start"() <{level = 10 : i32, message = "bqk,bkd->bqd"}> : () -> ()
    %cst_14 = arith.constant dense<0.000000e+00> : vector<2x8x32xf32>
    %30 = tpu.matmul %29, %9, %cst_14 {dimension_numbers = #tpu.dot_dimension_numbers<[2], [1], [1], [2], [0, 0, 0, 1, 1, 2], [0], [0]>} : vector<2x8x8xf32>, vector<2x8x32xf32>, vector<2x8x32xf32> -> vector<2x8x32xf32>
    "tpu.trace_stop"() : () -> ()
    %31 = vector.shape_cast %30 : vector<2x8x32xf32> to vector<16x32xf32>
    %32 = vector.extract_strided_slice %3 {offsets = [0, 96], sizes = [32, 32], strides = [1, 1]} : vector<32x128xf32> to vector<32x32xf32>
    %cst_15 = arith.constant dense<0.000000e+00> : vector<16x32xf32>
    %33 = tpu.matmul %31, %32, %cst_15 {dimension_numbers = #tpu.dot_dimension_numbers<[1], [0], [0], [1], [0, 0, 1, 1], [], []>} : vector<16x32xf32>, vector<32x32xf32>, vector<16x32xf32> -> vector<16x32xf32>
    %34 = arith.addf %2, %33 : vector<16x32xf32>
    %c0_16 = arith.constant 0 : index
    %c0_17 = arith.constant 0 : index
    %c0_18 = arith.constant 0 : index
    %35 = vector.load %arg4[%c0_16, %c0_17, %c0_18] : memref<2x2x32xf32, #tpu.memory_space<vmem>>, vector<1x1x32xf32>
    %36 = vector.shape_cast %35 : vector<1x1x32xf32> to vector<32xf32>
    %c0_19 = arith.constant 0 : index
    %c1 = arith.constant 1 : index
    %c0_20 = arith.constant 0 : index
    %37 = vector.load %arg4[%c0_19, %c1, %c0_20] : memref<2x2x32xf32, #tpu.memory_space<vmem>>, vector<1x1x32xf32>
    %38 = vector.shape_cast %37 : vector<1x1x32xf32> to vector<32xf32>
    %cst_21 = arith.constant dense<0.000000e+00> : vector<16xf32>
    %39 = vector.multi_reduction <add>, %34, %cst_21 [1] : vector<16x32xf32> to vector<16xf32>
    %40 = vector.shape_cast %39 : vector<16xf32> to vector<16x1xf32>
    %cst_22 = arith.constant 3.200000e+01 : f32
    %41 = vector.broadcast %cst_22 : f32 to vector<16x1xf32>
    %42 = arith.divf %40, %41 : vector<16x1xf32>
    %43 = vector.broadcast %42 : vector<16x1xf32> to vector<16x32xf32>
    %44 = arith.subf %34, %43 : vector<16x32xf32>
    %45 = vector.broadcast %42 : vector<16x1xf32> to vector<16x32xf32>
    %46 = arith.subf %34, %45 : vector<16x32xf32>
    %47 = arith.mulf %44, %46 : vector<16x32xf32>
    %cst_23 = arith.constant dense<0.000000e+00> : vector<16xf32>
    %48 = vector.multi_reduction <add>, %47, %cst_23 [1] : vector<16x32xf32> to vector<16xf32>
    %49 = vector.shape_cast %48 : vector<16xf32> to vector<16x1xf32>
    %cst_24 = arith.constant 3.200000e+01 : f32
    %50 = vector.broadcast %cst_24 : f32 to vector<16x1xf32>
    %51 = arith.divf %49, %50 : vector<16x1xf32>
    %52 = vector.broadcast %42 : vector<16x1xf32> to vector<16x32xf32>
    %53 = arith.subf %34, %52 : vector<16x32xf32>
    %cst_25 = arith.constant 9.99999974E-6 : f32
    %54 = vector.broadcast %cst_25 : f32 to vector<16x1xf32>
    %55 = arith.addf %51, %54 : vector<16x1xf32>
    %56 = math.rsqrt %55 : vector<16x1xf32>
    %57 = vector.broadcast %56 : vector<16x1xf32> to vector<16x32xf32>
    %58 = arith.mulf %53, %57 : vector<16x32xf32>
    %59 = vector.shape_cast %36 : vector<32xf32> to vector<1x32xf32>
    %60 = vector.broadcast %59 : vector<1x32xf32> to vector<16x32xf32>
    %61 = arith.mulf %58, %60 : vector<16x32xf32>
    %62 = vector.shape_cast %38 : vector<32xf32> to vector<1x32xf32>
    %63 = vector.broadcast %62 : vector<1x32xf32> to vector<16x32xf32>
    %64 = arith.addf %61, %63 : vector<16x32xf32>
    %c0_26 = arith.constant 0 : index
    %c0_27 = arith.constant 0 : index
    %65 = vector.load %arg5[%c0_26, %c0_27] : memref<32x128xf32, #tpu.memory_space<vmem>>, vector<32x128xf32>
    %cst_28 = arith.constant dense<0.000000e+00> : vector<16x128xf32>
    %66 = tpu.matmul %64, %65, %cst_28 {dimension_numbers = #tpu.dot_dimension_numbers<[1], [0], [0], [1], [0, 0, 1, 1], [], []>} : vector<16x32xf32>, vector<32x128xf32>, vector<16x128xf32> -> vector<16x128xf32>
    %c0_29 = arith.constant 0 : index
    %c0_30 = arith.constant 0 : index
    %67 = vector.load %arg6[%c0_29, %c0_30] : memref<1x128xf32, #tpu.memory_space<vmem>>, vector<1x128xf32>
    %68 = vector.broadcast %67 : vector<1x128xf32> to vector<16x128xf32>
    %69 = arith.addf %66, %68 : vector<16x128xf32>
    %70 = arith.mulf %69, %69 : vector<16x128xf32>
    %71 = arith.mulf %69, %70 : vector<16x128xf32>
    %cst_31 = arith.constant 4.471500e-02 : f32
    %72 = vector.broadcast %cst_31 : f32 to vector<16x128xf32>
    %73 = arith.mulf %72, %71 : vector<16x128xf32>
    %74 = arith.addf %69, %73 : vector<16x128xf32>
    %cst_32 = arith.constant 0.797884583 : f32
    %75 = vector.broadcast %cst_32 : f32 to vector<16x128xf32>
    %76 = arith.mulf %75, %74 : vector<16x128xf32>
    %77 = math.tanh %76 : vector<16x128xf32>
    %cst_33 = arith.constant 1.000000e+00 : f32
    %78 = vector.broadcast %cst_33 : f32 to vector<16x128xf32>
    %79 = arith.addf %78, %77 : vector<16x128xf32>
    %cst_34 = arith.constant 5.000000e-01 : f32
    %80 = vector.broadcast %cst_34 : f32 to vector<16x128xf32>
    %81 = arith.mulf %80, %79 : vector<16x128xf32>
    %82 = arith.mulf %69, %81 : vector<16x128xf32>
    %c0_35 = arith.constant 0 : index
    %c0_36 = arith.constant 0 : index
    %83 = vector.load %arg7[%c0_35, %c0_36] : memref<128x32xf32, #tpu.memory_space<vmem>>, vector<128x32xf32>
    %cst_37 = arith.constant dense<0.000000e+00> : vector<16x32xf32>
    %84 = tpu.matmul %82, %83, %cst_37 {dimension_numbers = #tpu.dot_dimension_numbers<[1], [0], [0], [1], [0, 0, 1, 1], [], []>} : vector<16x128xf32>, vector<128x32xf32>, vector<16x32xf32> -> vector<16x32xf32>
    %c0_38 = arith.constant 0 : index
    %c0_39 = arith.constant 0 : index
    %85 = vector.load %arg8[%c0_38, %c0_39] : memref<1x32xf32, #tpu.memory_space<vmem>>, vector<1x32xf32>
    %86 = vector.broadcast %85 : vector<1x32xf32> to vector<16x32xf32>
    %87 = arith.addf %84, %86 : vector<16x32xf32>
    %88 = arith.addf %64, %87 : vector<16x32xf32>
    %c1_40 = arith.constant 1 : index
    %c0_41 = arith.constant 0 : index
    %c0_42 = arith.constant 0 : index
    %89 = vector.load %arg4[%c1_40, %c0_41, %c0_42] : memref<2x2x32xf32, #tpu.memory_space<vmem>>, vector<1x1x32xf32>
    %90 = vector.shape_cast %89 : vector<1x1x32xf32> to vector<32xf32>
    %c1_43 = arith.constant 1 : index
    %c1_44 = arith.constant 1 : index
    %c0_45 = arith.constant 0 : index
    %91 = vector.load %arg4[%c1_43, %c1_44, %c0_45] : memref<2x2x32xf32, #tpu.memory_space<vmem>>, vector<1x1x32xf32>
    %92 = vector.shape_cast %91 : vector<1x1x32xf32> to vector<32xf32>
    %cst_46 = arith.constant dense<0.000000e+00> : vector<16xf32>
    %93 = vector.multi_reduction <add>, %88, %cst_46 [1] : vector<16x32xf32> to vector<16xf32>
    %94 = vector.shape_cast %93 : vector<16xf32> to vector<16x1xf32>
    %cst_47 = arith.constant 3.200000e+01 : f32
    %95 = vector.broadcast %cst_47 : f32 to vector<16x1xf32>
    %96 = arith.divf %94, %95 : vector<16x1xf32>
    %97 = vector.broadcast %96 : vector<16x1xf32> to vector<16x32xf32>
    %98 = arith.subf %88, %97 : vector<16x32xf32>
    %99 = vector.broadcast %96 : vector<16x1xf32> to vector<16x32xf32>
    %100 = arith.subf %88, %99 : vector<16x32xf32>
    %101 = arith.mulf %98, %100 : vector<16x32xf32>
    %cst_48 = arith.constant dense<0.000000e+00> : vector<16xf32>
    %102 = vector.multi_reduction <add>, %101, %cst_48 [1] : vector<16x32xf32> to vector<16xf32>
    %103 = vector.shape_cast %102 : vector<16xf32> to vector<16x1xf32>
    %cst_49 = arith.constant 3.200000e+01 : f32
    %104 = vector.broadcast %cst_49 : f32 to vector<16x1xf32>
    %105 = arith.divf %103, %104 : vector<16x1xf32>
    %106 = vector.broadcast %96 : vector<16x1xf32> to vector<16x32xf32>
    %107 = arith.subf %88, %106 : vector<16x32xf32>
    %cst_50 = arith.constant 9.99999974E-6 : f32
    %108 = vector.broadcast %cst_50 : f32 to vector<16x1xf32>
    %109 = arith.addf %105, %108 : vector<16x1xf32>
    %110 = math.rsqrt %109 : vector<16x1xf32>
    %111 = vector.broadcast %110 : vector<16x1xf32> to vector<16x32xf32>
    %112 = arith.mulf %107, %111 : vector<16x32xf32>
    %113 = vector.shape_cast %90 : vector<32xf32> to vector<1x32xf32>
    %114 = vector.broadcast %113 : vector<1x32xf32> to vector<16x32xf32>
    %115 = arith.mulf %112, %114 : vector<16x32xf32>
    %116 = vector.shape_cast %92 : vector<32xf32> to vector<1x32xf32>
    %117 = vector.broadcast %116 : vector<1x32xf32> to vector<16x32xf32>
    %118 = arith.addf %115, %117 : vector<16x32xf32>
    %119 = vector.shape_cast %118 : vector<16x32xf32> to vector<2x8x32xf32>
    "tpu.trace_start"() <{level = 10 : i32, message = "bks,bsh->bkh"}> : () -> ()
    %cst_51 = arith.constant dense<0.000000e+00> : vector<2x1x32xf32>
    %120 = tpu.matmul %1, %119, %cst_51 {dimension_numbers = #tpu.dot_dimension_numbers<[2], [1], [1], [2], [0, 0, 0, 1, 1, 2], [0], [0]>} : vector<2x1x8xf32>, vector<2x8x32xf32>, vector<2x1x32xf32> -> vector<2x1x32xf32>
    "tpu.trace_stop"() : () -> ()
    %121 = vector.shape_cast %120 : vector<2x1x32xf32> to vector<2x32xf32>
    %cst_52 = arith.constant dense<0.000000e+00> : vector<2x1xf32>
    %122 = vector.multi_reduction <add>, %1, %cst_52 [2] : vector<2x1x8xf32> to vector<2x1xf32>
    %cst_53 = arith.constant 1.000000e+00 : f32
    %123 = vector.broadcast %cst_53 : f32 to vector<2x1xf32>
    %124 = arith.maximumf %122, %123 : vector<2x1xf32>
    %125 = tpu.reciprocal %124 {approx = true} : vector<2x1xf32> -> vector<2x1xf32>
    %126 = vector.broadcast %125 : vector<2x1xf32> to vector<2x32xf32>
    %127 = arith.mulf %121, %126 : vector<2x32xf32>
    %c0_54 = arith.constant 0 : index
    %c0_55 = arith.constant 0 : index
    %128 = vector.load %arg12[%c0_54, %c0_55] : memref<2x32xf32, #tpu.memory_space<vmem>>, vector<2x32xf32>
    tpu.vector_store %arg12[%c0_54, %c0_55], %127 {strides = array<i32>} : memref<2x32xf32, #tpu.memory_space<vmem>>, vector<2x32xf32>,
    %c0_56 = arith.constant 0 : index
    %c0_57 = arith.constant 0 : index
    %129 = vector.load %arg9[%c0_56, %c0_57] : memref<32x64xf32, #tpu.memory_space<vmem>>, vector<32x64xf32>
    %cst_58 = arith.constant dense<0.000000e+00> : vector<2x64xf32>
    %130 = tpu.matmul %127, %129, %cst_58 {dimension_numbers = #tpu.dot_dimension_numbers<[1], [0], [0], [1], [0, 0, 1, 1], [], []>} : vector<2x32xf32>, vector<32x64xf32>, vector<2x64xf32> -> vector<2x64xf32>
    %131 = vector.extract_strided_slice %130 {offsets = [0, 0], sizes = [2, 32], strides = [1, 1]} : vector<2x64xf32> to vector<2x32xf32>
    %132 = vector.extract_strided_slice %130 {offsets = [0, 32], sizes = [2, 32], strides = [1, 1]} : vector<2x64xf32> to vector<2x32xf32>
    %c0_59 = arith.constant 0 : index
    %c0_60 = arith.constant 0 : index
    %133 = vector.load %arg10[%c0_59, %c0_60] : memref<2x32xf32, #tpu.memory_space<vmem>>, vector<2x32xf32>
    %134 = arith.subf %131, %133 : vector<2x32xf32>
    %135 = arith.mulf %134, %134 : vector<2x32xf32>
    %cst_61 = arith.constant dense<0.000000e+00> : vector<2xf32>
    %136 = vector.multi_reduction <add>, %135, %cst_61 [1] : vector<2x32xf32> to vector<2xf32>
    %137 = vector.shape_cast %136 : vector<2xf32> to vector<2x1xf32>
    %cst_62 = arith.constant 3.200000e+01 : f32
    %138 = vector.broadcast %cst_62 : f32 to vector<2x1xf32>
    %139 = arith.divf %137, %138 : vector<2x1xf32>
    %c0_63 = arith.constant 0 : index
    %c0_64 = arith.constant 0 : index
    %140 = vector.load %arg11[%c0_63, %c0_64] : memref<2x32xf32, #tpu.memory_space<vmem>>, vector<2x32xf32>
    %141 = arith.mulf %132, %140 : vector<2x32xf32>
    %cst_65 = arith.constant dense<0.000000e+00> : vector<2xf32>
    %142 = vector.multi_reduction <add>, %141, %cst_65 [1] : vector<2x32xf32> to vector<2xf32>
    %143 = vector.shape_cast %142 : vector<2xf32> to vector<2x1xf32>
    %144 = arith.mulf %132, %132 : vector<2x32xf32>
    %cst_66 = arith.constant dense<0.000000e+00> : vector<2xf32>
    %145 = vector.multi_reduction <add>, %144, %cst_66 [1] : vector<2x32xf32> to vector<2xf32>
    %146 = vector.shape_cast %145 : vector<2xf32> to vector<2x1xf32>
    %147 = arith.mulf %140, %140 : vector<2x32xf32>
    %cst_67 = arith.constant dense<0.000000e+00> : vector<2xf32>
    %148 = vector.multi_reduction <add>, %147, %cst_67 [1] : vector<2x32xf32> to vector<2xf32>
    %149 = vector.shape_cast %148 : vector<2xf32> to vector<2x1xf32>
    %150 = arith.mulf %146, %149 : vector<2x1xf32>
    %cst_68 = arith.constant 9.99999996E-13 : f32
    %151 = vector.broadcast %cst_68 : f32 to vector<2x1xf32>
    %152 = arith.addf %150, %151 : vector<2x1xf32>
    %153 = math.rsqrt %152 : vector<2x1xf32>
    %154 = arith.mulf %143, %153 : vector<2x1xf32>
    %cst_69 = arith.constant 1.000000e+00 : f32
    %155 = vector.broadcast %cst_69 : f32 to vector<2x1xf32>
    %156 = arith.subf %155, %154 : vector<2x1xf32>
    %157 = tpu.concatenate %139, %156 in 1 : vector<2x1xf32>, vector<2x1xf32> -> vector<2x2xf32>
    %c0_70 = arith.constant 0 : index
    %c0_71 = arith.constant 0 : index
    %158 = vector.load %arg13[%c0_70, %c0_71] : memref<2x2xf32, #tpu.memory_space<vmem>>, vector<2x2xf32>
    tpu.vector_store %arg13[%c0_70, %c0_71], %157 {strides = array<i32>} : memref<2x2xf32, #tpu.memory_space<vmem>>, vector<2x2xf32>,
    return
  }
  func.func @transform_0(%arg0: i32) -> (i32, i32, i32) {
    %c0_i32 = arith.constant 0 : i32
    %c0_i32_0 = arith.constant 0 : i32
    %c0_i32_1 = arith.constant 0 : i32
    %c0_i32_2 = arith.constant 0 : i32
    return %c0_i32, %c0_i32_0, %c0_i32_1 : i32, i32, i32
  }
  func.func @transform_1(%arg0: i32) -> (i32, i32, i32) {
    %c0_i32 = arith.constant 0 : i32
    %c0_i32_0 = arith.constant 0 : i32
    %c0_i32_1 = arith.constant 0 : i32
    %c0_i32_2 = arith.constant 0 : i32
    return %c0_i32, %c0_i32_0, %c0_i32_1 : i32, i32, i32
  }
  func.func @transform_2(%arg0: i32) -> (i32, i32) {
    %c0_i32 = arith.constant 0 : i32
    %c0_i32_0 = arith.constant 0 : i32
    %c0_i32_1 = arith.constant 0 : i32
    return %c0_i32, %c0_i32_0 : i32, i32
  }
  func.func @transform_3(%arg0: i32) -> (i32, i32, i32) {
    %c0_i32 = arith.constant 0 : i32
    %c0_i32_0 = arith.constant 0 : i32
    %c0_i32_1 = arith.constant 0 : i32
    %c0_i32_2 = arith.constant 0 : i32
    return %c0_i32, %c0_i32_0, %c0_i32_1 : i32, i32, i32
  }
  func.func @transform_4(%arg0: i32) -> (i32, i32) {
    %c0_i32 = arith.constant 0 : i32
    %c0_i32_0 = arith.constant 0 : i32
    %c0_i32_1 = arith.constant 0 : i32
    return %c0_i32, %c0_i32_0 : i32, i32
  }
  func.func @transform_5(%arg0: i32) -> (i32, i32) {
    %c0_i32 = arith.constant 0 : i32
    %c0_i32_0 = arith.constant 0 : i32
    %c0_i32_1 = arith.constant 0 : i32
    return %c0_i32, %c0_i32_0 : i32, i32
  }
  func.func @transform_6(%arg0: i32) -> (i32, i32) {
    %c0_i32 = arith.constant 0 : i32
    %c0_i32_0 = arith.constant 0 : i32
    %c0_i32_1 = arith.constant 0 : i32
    return %c0_i32, %c0_i32_0 : i32, i32
  }
  func.func @transform_7(%arg0: i32) -> (i32, i32) {
    %c0_i32 = arith.constant 0 : i32
    %c0_i32_0 = arith.constant 0 : i32
    %c0_i32_1 = arith.constant 0 : i32
    return %c0_i32, %c0_i32_0 : i32, i32
  }
  func.func @transform_8(%arg0: i32) -> (i32, i32) {
    %c0_i32 = arith.constant 0 : i32
    %c0_i32_0 = arith.constant 0 : i32
    %c0_i32_1 = arith.constant 0 : i32
    return %c0_i32, %c0_i32_0 : i32, i32
  }
  func.func @transform_9(%arg0: i32) -> (i32, i32) {
    %c0_i32 = arith.constant 0 : i32
    %c0_i32_0 = arith.constant 0 : i32
    %c0_i32_1 = arith.constant 0 : i32
    return %c0_i32, %c0_i32_0 : i32, i32
  }
  func.func @transform_10(%arg0: i32) -> (i32, i32) {
    %c0_i32 = arith.constant 0 : i32
    %c0_i32_0 = arith.constant 0 : i32
    %c0_i32_1 = arith.constant 0 : i32
    return %c0_i32, %c0_i32_0 : i32, i32
  }
  func.func @transform_11(%arg0: i32) -> (i32, i32) {
    %c0_i32 = arith.constant 0 : i32
    %c0_i32_0 = arith.constant 0 : i32
    %c0_i32_1 = arith.constant 0 : i32
    return %c0_i32, %c0_i32_0 : i32, i32
  }
  func.func @transform_12(%arg0: i32) -> (i32, i32) {
    %c0_i32 = arith.constant 0 : i32
    %c0_i32_0 = arith.constant 0 : i32
    %c0_i32_1 = arith.constant 0 : i32
    return %c0_i32, %c0_i32_0 : i32, i32
  }
}

</mosaic_0001>

<bundles_post_ra>
// kernel: student_forward.1
= control target key start
LH: loop header
LB: loop body
LE: loop exit
PB: predicated region body
PF: predicated region fallthrough
CT: control target
= control target key end

     0   :  { %vm49_vm0 = vcmask 261120   ;;  %s1812_s0 = inlined_call_operand.vmem [shape: f32[2,8,32], index: 0, kind: input, shape index: {}]   ;;  %s1813_s1 = inlined_call_operand.vmem [shape: f32[2,1,8], index: 1, kind: input, shape index: {}]   ;;  %s1814_s2 = inlined_call_operand.vmem [shape: f32[32,128], index: 2, kind: input, shape index: {}]   ;;  %s1815_s3 = inlined_call_operand.vmem [shape: f32[2,2,32], index: 3, kind: input, shape index: {}]   ;;  %s1816_s4 = inlined_call_operand.vmem [shape: f32[32,128], index: 4, kind: input, shape index: {}]   ;;  %s1817_s5 = inlined_call_operand.vmem [shape: f32[1,128], index: 5, kind: input, shape index: {}]   ;;  %s1818_s6 = inlined_call_operand.vmem [shape: f32[128,32], index: 6, kind: input, shape index: {}]   ;;  %s1819_s7 = inlined_call_operand.vmem [shape: f32[1,32], index: 7, kind: input, shape index: {}]   ;;  %s1820_s8 = inlined_call_operand.vmem [shape: f32[32,64], index: 8, kind: input, shape index: {}]   ;;  %s1821_s9 = inlined_call_operand.vmem [shape: f32[2,32], index: 9, kind: input, shape index: {}]   ;;  %s1822_s10 = inlined_call_operand.vmem [shape: f32[2,32], index: 10, kind: input, shape index: {}]   ;;  %s1823_s11 = inlined_call_operand.hbm [shape: f32[2,32], index: 11, kind: output, shape index: {0}]   ;;  %s1824_s12 = inlined_call_operand.vmem [shape: f32[2,2], index: 12, kind: output, shape index: {1}]  }
   0x1   :  { %v1570_v0 = vld [vmem:[%s1814_s2] sm:$0xff]  ;;  %v1575_v1 = vld [vmem:[%s1814_s2 + $0x8] sm:$0xff]  ;;  %v1580_v2 = vld [vmem:[%s1814_s2 + $0x10] sm:$0xff] }
   0x2   :  { %v1435_v3 = vpack.i.bf16 %v1575_v1, %v1570_v0  ;;  %v1366_v4 = vpack.c.bf16 %v1575_v1, %v1570_v0  ;;  %v1589_v5 = vld [vmem:[%s1814_s2 + $0x18] sm:$0xff]  ;;  %v1594_v6 = vld [vmem:[%s1812_s0] sm:$0xff] }
   0x3   :  { %v1370_v7 = vpack.c.bf16 %v1589_v5, %v1580_v2  ;;  %1265 = vmatprep.mubr.msk.f32.mxu1 %vm49_vm0, %v1594_v6 }
   0x4   :  { %18 = vsyncpa [#allocation3], 0  ;;  %1367 = vmatprep.subr.bf16.mxu1 %v1366_v4  ;;  %v1603_v8 = vld [vmem:[%s1812_s0 + $0x8] sm:$0xff]  ;;  %v1495_v9 = vmov 0.0   ;;  %vm1496_vm1 = vmmov 0   ;;  %s1497_s2 = smov 96   ;;  %v293_v14 = vlaneseq  ;;  %v1440_v46 = vpack.i.bf16 %v1589_v5, %v1580_v2 }
   0x5   :  { %1369 = vmatpush3.bf16.msra.mxu1 %v1366_v4  ;;  %1278 = vmatprep.subr.mxu0 %v1495_v9  ;;  %v1628_v15 = vld [vmem:[%s1813_s1] sm:$0x1]  ;;  %v1634_v18 = vld [vmem:[%s1813_s1 + $0x1] sm:$0x1]  ;;  %vm305_vm2 = vcmask 64512   ;;  %s1498_s1 = smov 64  }
   0x6   :  { %1371 = vmatprep.subr.bf16.mxu1 %v1370_v7  ;;  %1280 = vmatprep.mubr.msk.f32.mxu0 %vm1496_vm1, %v1495_v9  ;;  %v287_v16 = vsub.f32 1.0, %v1628_v15  ;;  %v294_v17 = vshrl.u32 %v293_v14, 7  ;;  %v288_v21 = vsub.f32 1.0, %v1634_v18  ;;  %s1499_s18 = smov 32   ;;  %vm1017_vm3 = vcmask 57344  }
   0x7   :  { %vm1041_vm4 = vcmask 1041409   ;;  %vm1044_vm5 = vcmask 254976  }
   0x8   :  { %v289_v19 = vmul.f32 -1e+09, %v287_v16  ;;  %v1636_v20 = vsub.s32 0, %v294_v17  ;;  %v290_v23 = vmul.f32 -1e+09, %v288_v21 }
   0x9   :  { %1373 = vmatpush3.bf16.msra.mxu1 %v1370_v7 }
   0xa   :  { %1268 = vmatprep.subr.mxu1 %v1495_v9  ;;  %v296_v22 = vrot.slane %v289_v19, %v1636_v20  ;;  %v300_v28 = vrot.slane %v290_v23, %v1636_v20  ;;  %v621_v23 = vld [vmem:[%s1816_s4 + $0x8] sm:$0xff] }
   0xc   :  { %1266 = vmatmul.mubr.msk.f32.vlgmr.msra.gmra.mrb[0].mxu1 %vm49_vm0, %v1603_v8 }
   0xd   :  { %1270 = vmatprep.mubr.msk.f32.mxu1 %vm1496_vm1, %v1495_v9 }
  0xdf   :  { %v1267_v10 = vpop.f32.mrb[0].mxu1 }
  0xe0   :  { %v122_v11 = vpop.f32.mrb[1].mxu1 }
  0xe1   :  { %132 = vrot.lane.b32.xlu0 %v122_v11, %s1497_s2 }
  0xe5   :  { %209 = vrot.lane.b32.xlu0 %v1267_v10, %s1497_s2 }
 0x153   :  { %v133_v12 = vpop.permute.xlu0 %132 }
 0x154   :  { %1269 = vmatpush3.xpose.msk.msra.mxu1 %vm49_vm0, %v133_v12 }
 0x155   :  { %1273 = vmatprep.subr.mxu1 %v1495_v9 }
 0x157   :  { %1271 = vmatmul.mubr.msk.f32.vlgmr.msra.gmra.mrb[2].mxu1 %vm49_vm0, %v122_v11  ;;  %v210_v13 = vpop.permute.xlu0 %209 }
 0x158   :  { %1274 = vmatpush3.xpose.msk.msra.mxu1 %vm49_vm0, %v210_v13  ;;  %1275 = vmatprep.mubr.msk.f32.mxu1 %vm1496_vm1, %v1495_v9 }
 0x159   :  { %1283 = vmatprep.subr.mxu1 %v1495_v9 }
 0x15b   :  { %1276 = vmatmul.mubr.msk.f32.vlgmr.msra.gmra.mrb[4].mxu1 %vm49_vm0, %v1267_v10 }
 0x15c   :  { %1285 = vmatprep.mubr.msk.f32.mxu1 %vm1496_vm1, %v1495_v9 }
 0x22a   :  { %v204_v24 = vpop.f32.mrb[2].mxu1 }
 0x22b   :  { %v285_v25 = vmul.f32 0.17677669, %v204_v24  ;;  %v1272_v26 = vpop.f32.mrb[3].mxu1 }
 0x22c   :  { %v623_v26 = vld [vmem:[%s1816_s4 + $0x18] sm:$0xff] }
 0x22d   :  { %v303_v27 = vadd.f32 %v296_v22, %v285_v25  ;;  %v622_v25 = vld [vmem:[%s1816_s4 + $0x10] sm:$0xff] }
 0x22e   :  { %v281_v29 = vpop.f32.mrb[4].mxu1 }
 0x22f   :  { %v286_v30 = vmul.f32 0.17677669, %v281_v29  ;;  %v1277_v31 = vpop.f32.mrb[5].mxu1  ;;  %v306_v32 = vsel %vm305_vm2, %v303_v27, -inf }
 0x230   :  { %307 = vmax.xlane.f32.xlu1 %v306_v32 }
 0x231   :  { %v304_v33 = vadd.f32 %v300_v28, %v286_v30 }
 0x233   :  { %v309_v34 = vsel %vm305_vm2, %v304_v33, -inf }
 0x234   :  { %310 = vmax.xlane.f32.xlu1 %v309_v34 }
 0x245   :  { %328 = vrot.lane.b32.xlu1 %v122_v11, %s1498_s1 }
 0x2bd   :  { %v308_v35 = vpop.xlane.xlu1 %307 }
 0x2be   :  { %v312_v36 = vsub.f32 %v303_v27, %v308_v35  ;;  %v1386_v27 = vpack.c.bf16 %v623_v26, %v622_v25  ;;  %v1191_v35 = vld [vmem:[%s1815_s3] ss:$0 sm:$0xff] }
 0x2c0   :  { %v314_v37 = vmul.f32 1.442695, %v312_v36 }
 0x2c1   :  { %v311_v38 = vpop.xlane.xlu1 %310 }
 0x2c2   :  { %1445 = vpow2.f32 %v314_v37  ;;  %v313_v39 = vsub.f32 %v304_v33, %v311_v38  ;;  %v1192_v37 = vld [vmem:[%s1815_s3 + $0x1] ss:$0 sm:$0xff] }
 0x2c4   :  { %v316_v40 = vmul.f32 1.442695, %v313_v39 }
 0x2c5   :  { %v329_v41 = vpop.permute.xlu1 %328 }
 0x2c6   :  { %1447 = vpow2.f32 %v316_v40  ;;  %1279 = vmatpush3.msra.mxu0 %v329_v41 }
 0x2cc   :  { %v1446_v42 = vpop.eup %1445 }
 0x2cd   :  { %v318_v43 = vsel %vm305_vm2, %v1446_v42, 0.0 }
 0x2ce   :  { %319 = vadd.xlane.f32.xlu0 %v318_v43 }
 0x2d0   :  { %v1448_v44 = vpop.eup %1447 }
 0x2d1   :  { %v321_v45 = vsel %vm305_vm2, %v1448_v44, 0.0 }
 0x2d2   :  { %322 = vadd.xlane.f32.xlu1 %v321_v45  ;;  %v731_v45 = vld [vmem:[%s1818_s6 + $0x8] sm:$0xff] }
 0x2e3   :  { %404 = vrot.lane.b32.xlu1 %v1267_v10, %s1498_s1 }
 0x2e7   :  { %1436 = vrot.lane.b32.xlu1 %v1435_v3, %s1499_s18 }
 0x2eb   :  { %1441 = vrot.lane.b32.xlu1 %v1440_v46, %s1499_s18 }
 0x35b   :  { %v320_v47 = vpop.xlane.xlu0 %319 }
 0x35c   :  { %1449 = vrcp.f32 %v320_v47  ;;  %v732_v47 = vld [vmem:[%s1818_s6 + $0x10] sm:$0xff] }
 0x35f   :  { %v323_v48 = vpop.xlane.xlu1 %322 }
 0x360   :  { %1451 = vrcp.f32 %v323_v48  ;;  %v733_v48 = vld [vmem:[%s1818_s6 + $0x18] sm:$0xff] }
 0x363   :  { %v405_v49 = vpop.permute.xlu1 %404 }
 0x364   :  { %1284 = vmatpush3.msra.mxu1 %v405_v49  ;;  %v1394_v49 = vpack.c.bf16 %v733_v48, %v732_v47 }
 0x366   :  { %v1450_v50 = vpop.eup %1449 }
 0x367   :  { %v325_v51 = vmul.f32 %v1450_v50, %v1446_v42  ;;  %v1437_v52 = vpop.permute.xlu1 %1436  ;;  %v734_v50 = vld [vmem:[%s1818_s6 + $0x20] sm:$0xff] }
 0x368   :  { %v1439_v53 = vunpack.i.h.bf16 %v1437_v52  ;;  %v1438_v54 = vunpack.i.l.bf16 %v1437_v52 }
 0x369   :  { %1281 = vmatmul.mubr.msk.f32.vlgmr.msra.gmra.mrb[0].mxu0 %vm305_vm2, %v325_v51  ;;  %v735_v51 = vld [vmem:[%s1818_s6 + $0x28] sm:$0xff] }
 0x36a   :  { %v1452_v55 = vpop.eup %1451  ;;  %v1374_v56 = vpack.c.bf16 %v1439_v53, %v1438_v54  ;;  %v1398_v52 = vpack.c.bf16 %v735_v51, %v734_v50  ;;  %v736_v53 = vld [vmem:[%s1818_s6 + $0x30] sm:$0xff]  ;;  %v737_v54 = vld [vmem:[%s1818_s6 + $0x38] sm:$0xff]  ;;  %v1018_v51 = vsel %vm1017_vm3, %v1628_v15, 0.0 }
 0x36b   :  { %v327_v57 = vmul.f32 %v1452_v55, %v1448_v44  ;;  %v1442_v58 = vpop.permute.xlu1 %1441  ;;  %v730_v44 = vld [vmem:[%s1818_s6] sm:$0xff]  ;;  %v1402_v55 = vpack.c.bf16 %v737_v54, %v736_v53 }
 0x36c   :  { %v1444_v59 = vunpack.i.h.bf16 %v1442_v58  ;;  %v1443_v60 = vunpack.i.l.bf16 %v1442_v58  ;;  %1375 = vmatprep.subr.bf16.mxu0 %v1374_v56  ;;  %v1390_v46 = vpack.c.bf16 %v731_v45, %v730_v44  ;;  %v740_v58 = vld [vmem:[%s1818_s6 + $0x50] sm:$0xff] }
 0x36d   :  { %1286 = vmatmul.mubr.msk.f32.vlgmr.msra.gmra.mrb[6].mxu1 %vm305_vm2, %v327_v57  ;;  %1377 = vmatpush3.bf16.msra.mxu0 %v1374_v56  ;;  %v738_v56 = vld [vmem:[%s1818_s6 + $0x40] sm:$0xff]  ;;  %v739_v57 = vld [vmem:[%s1818_s6 + $0x48] sm:$0xff] }
 0x36e   :  { %v1378_v61 = vpack.c.bf16 %v1444_v59, %v1443_v60  ;;  %v1406_v59 = vpack.c.bf16 %v739_v57, %v738_v56  ;;  %v741_v60 = vld [vmem:[%s1818_s6 + $0x58] sm:$0xff] }
 0x370   :  { %1379 = vmatprep.subr.bf16.mxu0 %v1378_v61 }
 0x371   :  { %1381 = vmatpush3.bf16.msra.mxu0 %v1378_v61  ;;  %v1410_v61 = vpack.c.bf16 %v741_v60, %v740_v58 }
 0x372   :  { %1391 = vmatprep.subr.bf16.mxu0 %v1390_v46 }
 0x43c   :  { %v400_v62 = vpop.f32.mrb[0].mxu0 }
 0x43d   :  { %v1282_v63 = vpop.f32.mrb[1].mxu0  ;;  %1296 = vmatprep.mubr.msk.f32.mxu0 %vm49_vm0, %v400_v62  ;;  %v742_v62 = vld [vmem:[%s1818_s6 + $0x60] sm:$0xff] }
 0x43e   :  { %v743_v63 = vld [vmem:[%s1818_s6 + $0x68] sm:$0xff] }
 0x440   :  { %v476_v0 = vpop.f32.mrb[6].mxu1 }
 0x441   :  { %v1287_v1 = vpop.f32.mrb[7].mxu1  ;;  %1297 = vmatmul.mubr.msk.f32.vlgmr.msra.gmra.mrb[2].mxu0 %vm49_vm0, %v476_v0  ;;  %v1414_v0 = vpack.c.bf16 %v743_v63, %v742_v62 }
 0x442   :  { %1393 = vmatpush3.bf16.msra.mxu0 %v1390_v46  ;;  %v744_v1 = vld [vmem:[%s1818_s6 + $0x70] sm:$0xff] }
 0x443   :  { %1395 = vmatprep.subr.bf16.mxu0 %v1394_v49 }
 0x446   :  { %1397 = vmatpush3.bf16.msra.mxu0 %v1394_v49 }
 0x447   :  { %1399 = vmatprep.subr.bf16.mxu0 %v1398_v52 }
 0x44a   :  { %1401 = vmatpush3.bf16.msra.mxu0 %v1398_v52 }
 0x44b   :  { %1403 = vmatprep.subr.bf16.mxu0 %v1402_v55 }
 0x44e   :  { %1405 = vmatpush3.bf16.msra.mxu0 %v1402_v55 }
 0x44f   :  { %1407 = vmatprep.subr.bf16.mxu0 %v1406_v59 }
 0x452   :  { %1409 = vmatpush3.bf16.msra.mxu0 %v1406_v59  ;;  %v1199_v59 = vld [vmem:[%s1815_s3 + $0x2] ss:$0 sm:$0xff] }
 0x453   :  { %1411 = vmatprep.subr.bf16.mxu0 %v1410_v61 }
 0x456   :  { %1413 = vmatpush3.bf16.msra.mxu0 %v1410_v61  ;;  %v1200_v61 = vld [vmem:[%s1815_s3 + $0x3] ss:$0 sm:$0xff] }
 0x457   :  { %1415 = vmatprep.subr.bf16.mxu0 %v1414_v0 }
 0x45a   :  { %1417 = vmatpush3.bf16.msra.mxu0 %v1414_v0 }
 0x514   :  { %v1298_v2 = vpop.f32.mrb[2].mxu0 }
 0x515   :  { %v578_v3 = vadd.f32 %v1298_v2, %v1603_v8  ;;  %v568_v4 = vpop.f32.mrb[3].mxu0  ;;  %v745_v2 = vld [vmem:[%s1818_s6 + $0x78] sm:$0xff] }
 0x516   :  { %v577_v5 = vadd.f32 %v568_v4, %v1594_v6  ;;  %v620_v6 = vld [vmem:[%s1816_s4] sm:$0xff] }
 0x517   :  { %v584_v7 = vsel %vm49_vm0, %v578_v3, 0.0  ;;  %v1382_v24 = vpack.c.bf16 %v621_v23, %v620_v6  ;;  %v1193_v4 = vld [vmem:[%s1817_s5] ss:$0 sm:$0xff] }
 0x518   :  { %585 = vadd.xlane.f32.xlu1 %v584_v7  ;;  %v581_v10 = vsel %vm49_vm0, %v577_v5, 0.0 }
 0x519   :  { %582 = vadd.xlane.f32.xlu0 %v581_v10  ;;  %1383 = vmatprep.subr.bf16.mxu1 %v1382_v24 }
 0x51a   :  { %1385 = vmatpush3.bf16.msra.mxu1 %v1382_v24 }
 0x51b   :  { %1387 = vmatprep.subr.bf16.mxu1 %v1386_v27 }
 0x51e   :  { %1389 = vmatpush3.bf16.msra.mxu1 %v1386_v27 }
 0x51f   :  { %1345 = vmatprep.subr.mxu1 %v1495_v9 }
 0x5a5   :  { %v586_v11 = vpop.xlane.xlu1 %585 }
 0x5a6   :  { %v589_v12 = vmul.f32 0.03125, %v586_v11  ;;  %v583_v13 = vpop.xlane.xlu0 %582 }
 0x5a7   :  { %v588_v14 = vmul.f32 0.03125, %v583_v13 }
 0x5a8   :  { %v591_v16 = vsub.f32 %v578_v3, %v589_v12  ;;  %v1418_v3 = vpack.c.bf16 %v745_v2, %v744_v1 }
 0x5a9   :  { %v590_v17 = vsub.f32 %v577_v5, %v588_v14 }
 0x5aa   :  { %v593_v22 = vmul.f32 %v591_v16, %v591_v16  ;;  %1419 = vmatprep.subr.bf16.mxu0 %v1418_v3 }
 0x5ab   :  { %v592_v19 = vmul.f32 %v590_v17, %v590_v17  ;;  %1421 = vmatpush3.bf16.msra.mxu0 %v1418_v3 }
 0x5ac   :  { %v597_v8 = vsel %vm49_vm0, %v593_v22, 0.0 }
 0x5ad   :  { %v594_v21 = vsel %vm49_vm0, %v592_v19, 0.0 }
 0x5ae   :  { %595 = vadd.xlane.f32.xlu0 %v594_v21 }
 0x5b2   :  { %598 = vadd.xlane.f32.xlu0 %v597_v8 }
 0x63b   :  { %v596_v28 = vpop.xlane.xlu0 %595 }
 0x63c   :  { %v600_v29 = vmul.f32 0.03125, %v596_v28 }
 0x63e   :  { %v602_v30 = vadd.f32 1e-05, %v600_v29 }
 0x63f   :  { %v599_v31 = vpop.xlane.xlu0 %598 }
 0x640   :  { %1453 = vrsqrt.f32 %v602_v30  ;;  %v601_v32 = vmul.f32 0.03125, %v599_v31  ;;  %v1196_v31 = vld [vmem:[%s1819_s7] ss:$0 sm:$0xff] }
 0x642   :  { %v603_v33 = vadd.f32 1e-05, %v601_v32 }
 0x644   :  { %1455 = vrsqrt.f32 %v603_v33 }
 0x64a   :  { %v1454_v34 = vpop.eup %1453 }
 0x64b   :  { %v606_v36 = vmul.f32 %v1454_v34, %v590_v17 }
 0x64d   :  { %v612_v38 = vmul.f32 %v1191_v35, %v606_v36 }
 0x64e   :  { %v1456_v39 = vpop.eup %1455 }
 0x64f   :  { %v607_v40 = vmul.f32 %v1456_v39, %v591_v16  ;;  %v1681_v41 = vadd.f32 %v1192_v37, %v612_v38 }
 0x651   :  { %v613_v42 = vmul.f32 %v1191_v35, %v607_v40  ;;  %1307 = vmatprep.mubr.msk.f32.mxu1 %vm49_vm0, %v1681_v41 }
 0x653   :  { %v1685_v43 = vadd.f32 %v1192_v37, %v613_v42 }
 0x655   :  { %1308 = vmatmul.mubr.msk.f32.vlgmr.msra.gmra.mrb[8].mxu1 %vm49_vm0, %v1685_v43 }
 0x656   :  { %1347 = vmatprep.mubr.msk.f32.mxu1 %vm1496_vm1, %v1495_v9 }
 0x728   :  { %v1309_v5 = vpop.f32.mrb[8].mxu1 }
 0x729   :  { %v709_v7 = vadd.f32 %v1309_v5, %v1193_v4  ;;  %v703_v10 = vpop.f32.mrb[9].mxu1 }
 0x72a   :  { %v704_v11 = vadd.f32 %v1193_v4, %v703_v10  ;;  %v1046_v4 = vld [vmem:[%s1820_s8] sm:$0xff] }
 0x72b   :  { %v713_v12 = vmul.f32 %v709_v7, %v709_v7 }
 0x72c   :  { %v712_v13 = vmul.f32 %v704_v11, %v704_v11 }
 0x72d   :  { %v715_v14 = vmul.f32 %v713_v12, %v709_v7 }
 0x72e   :  { %v714_v16 = vmul.f32 %v712_v13, %v704_v11 }
 0x72f   :  { %v717_v17 = vmul.f32 0.044715, %v715_v14 }
 0x730   :  { %v716_v19 = vmul.f32 0.044715, %v714_v16 }
 0x731   :  { %v719_v21 = vadd.f32 %v717_v17, %v709_v7 }
 0x732   :  { %v718_v22 = vadd.f32 %v716_v19, %v704_v11 }
 0x733   :  { %v721_v8 = vmul.f32 0.7978846, %v719_v21 }
 0x734   :  { %v720_v6 = vmul.f32 0.7978846, %v718_v22 }
 0x735   :  { %1457 = vtanh.f32 %v721_v8 }
 0x736   :  { %1459 = vtanh.f32 %v720_v6 }
 0x73f   :  { %v1458_v23 = vpop.eup %1457 }
 0x740   :  { %v1460_v24 = vpop.eup %1459  ;;  %v725_v25 = vadd.f32 1.0, %v1458_v23 }
 0x741   :  { %v724_v26 = vadd.f32 1.0, %v1460_v24 }
 0x742   :  { %v727_v27 = vmul.f32 0.5, %v725_v25 }
 0x743   :  { %v726_v28 = vmul.f32 0.5, %v724_v26 }
 0x744   :  { %v729_v30 = vmul.f32 %v727_v27, %v709_v7  ;;  %v1500_v7 = vmov 0.0|0.0  }
 0x745   :  { %v728_v29 = vmul.f32 %v726_v28, %v704_v11  ;;  %v1129_v11 = vld [vmem:[%s1822_s10] sm:$0x3] }
 0x747   :  { %1342 = vmatprep.mubr.f32.mxu0 %v728_v29 }
 0x748   :  { %1343 = vmatmul.mubr.f32.vlgmr.msra.gmra.mrb[4].mxu0 %v729_v30 }
 0x81b   :  { %v1344_v32 = vpop.f32.mrb[4].mxu0 }
 0x81c   :  { %v819_v33 = vpop.f32.mrb[5].mxu0  ;;  %v825_v34 = vadd.f32 %v1344_v32, %v1196_v31 }
 0x81d   :  { %v820_v35 = vadd.f32 %v1196_v31, %v819_v33 }
 0x81e   :  { %v829_v38 = vadd.f32 %v825_v34, %v1685_v43  ;;  %v1021_v43 = vsel %vm1017_vm3, %v1634_v18, 0.0 }
 0x81f   :  { %v828_v36 = vadd.f32 %v820_v35, %v1681_v41  ;;  %v1122_v35 = vld [vmem:[%s1821_s9] sm:$0x3] }
 0x820   :  { %v836_v39 = vsel %vm49_vm0, %v829_v38, 0.0 }
 0x821   :  { %v833_v37 = vsel %vm49_vm0, %v828_v36, 0.0 }
 0x822   :  { %834 = vadd.xlane.f32.xlu0 %v833_v37 }
 0x826   :  { %837 = vadd.xlane.f32.xlu0 %v836_v39 }
 0x8af   :  { %v835_v40 = vpop.xlane.xlu0 %834 }
 0x8b0   :  { %v839_v42 = vmul.f32 0.03125, %v835_v40 }
 0x8b2   :  { %v841_v44 = vsub.f32 %v828_v36, %v839_v42 }
 0x8b3   :  { %v838_v45 = vpop.xlane.xlu0 %837 }
 0x8b4   :  { %v840_v46 = vmul.f32 0.03125, %v838_v45  ;;  %v843_v47 = vmul.f32 %v841_v44, %v841_v44 }
 0x8b6   :  { %v842_v48 = vsub.f32 %v829_v38, %v840_v46  ;;  %v845_v49 = vsel %vm49_vm0, %v843_v47, 0.0 }
 0x8b7   :  { %846 = vadd.xlane.f32.xlu0 %v845_v49 }
 0x8b8   :  { %v844_v50 = vmul.f32 %v842_v48, %v842_v48 }
 0x8ba   :  { %v848_v41 = vsel %vm49_vm0, %v844_v50, 0.0 }
 0x8bb   :  { %849 = vadd.xlane.f32.xlu0 %v848_v41 }
 0x8bf   :  { %1022 = vadd.xlane.f32.xlu0 %v1021_v43 }
 0x8c3   :  { %1019 = vadd.xlane.f32.xlu0 %v1018_v51 }
 0x8d9   :  { %1131 = vrot.lane.b32.xlu0 %v1129_v11, %s1499_s18 }
 0x944   :  { %v847_v52 = vpop.xlane.xlu0 %846 }
 0x945   :  { %v851_v53 = vmul.f32 0.03125, %v847_v52 }
 0x947   :  { %v853_v54 = vadd.f32 1e-05, %v851_v53 }
 0x948   :  { %v850_v55 = vpop.xlane.xlu0 %849 }
 0x949   :  { %1461 = vrsqrt.f32 %v853_v54  ;;  %v852_v56 = vmul.f32 0.03125, %v850_v55 }
 0x94b   :  { %v854_v57 = vadd.f32 1e-05, %v852_v56 }
 0x94c   :  { %v1023_v12 = vpop.xlane.xlu0 %1022 }
 0x94d   :  { %1463 = vrsqrt.f32 %v854_v57  ;;  %v1025_v14 = vmax.f32 %v1023_v12, 1.0 }
 0x94f   :  { %1465 = vrcp.f32 %v1025_v14 }
 0x950   :  { %v1020_v13 = vpop.xlane.xlu0 %1019 }
 0x951   :  { %v1024_v16 = vmax.f32 %v1020_v13, 1.0 }
 0x953   :  { %v1462_v58 = vpop.eup %1461  ;;  %1467 = vrcp.f32 %v1024_v16 }
 0x954   :  { %v857_v60 = vmul.f32 %v1462_v58, %v841_v44  ;;  %v1132_v32 = vpop.permute.xlu0 %1131 }
 0x956   :  { %v863_v62 = vmul.f32 %v1199_v59, %v857_v60 }
 0x957   :  { %v1464_v63 = vpop.eup %1463 }
 0x958   :  { %v869_v0 = vadd.f32 %v1200_v61, %v863_v62  ;;  %v858_v1 = vmul.f32 %v1464_v63, %v842_v48 }
 0x959   :  { %v1466_v17 = vpop.eup %1465 }
 0x95a   :  { %1346 = vmatpush3.msra.mxu1 %v869_v0  ;;  %v864_v2 = vmul.f32 %v1199_v59, %v858_v1  ;;  %v1035_v6 = vrot.slane %v1466_v17, %v1636_v20 }
 0x95b   :  { %1348 = vmatmul.mubr.msk.f32.vlgmr.msra.gmra.mrb[10].mxu1 %vm305_vm2, %v1628_v15  ;;  %1350 = vmatprep.subr.mxu1 %v1495_v9  ;;  %v1047_v15 = vld [vmem:[%s1820_s8 + $0x8] sm:$0xff] }
 0x95c   :  { %v870_v3 = vadd.f32 %v1200_v61, %v864_v2  ;;  %1352 = vmatprep.mubr.msk.f32.mxu1 %vm1496_vm1, %v1495_v9  ;;  %v1423_v5 = vpack.c.bf16 %v1047_v15, %v1046_v4 }
 0x95d   :  { %v1468_v19 = vpop.eup %1467 }
 0x95e   :  { %1351 = vmatpush3.msra.mxu1 %v870_v3  ;;  %v1031_v8 = vrot.slane %v1468_v19, %v1636_v20  ;;  %v1150_v20 = vmul.f32 %v1129_v11, %v1129_v11 }
 0x95f   :  { %1353 = vmatmul.mubr.msk.f32.vlgmr.msra.gmra.mrb[12].mxu1 %vm305_vm2, %v1634_v18  ;;  %1422 = vmatprep.subr.bf16.mxu1 %v1500_v7  ;;  %v1048_v18 = vld [vmem:[%s1820_s8 + $0x10] sm:$0xff] }
 0x960   :  { %1363 = vmatprep.mubr.msk.f32.mxu1 %vm1496_vm1, %v1495_v9  ;;  %1424 = vmatpush3.bf16.msra.mxu1 %v1423_v5  ;;  %v1049_v9 = vld [vmem:[%s1820_s8 + $0x18] sm:$0xff]  ;;  %v1151_v34 = vsel %vm1044_vm5, %v1150_v20, 0.0 }
 0x961   :  { %1425 = vmatprep.subr.bf16.mxu1 %v1500_v7  ;;  %v1426_v10 = vpack.c.bf16 %v1049_v9, %v1048_v18 }
 0x964   :  { %1427 = vmatpush3.bf16.msra.mxu1 %v1426_v10 }
 0xa2e   :  { %v940_v21 = vpop.f32.mrb[10].mxu1 }
 0xa2f   :  { %v1349_v22 = vpop.f32.mrb[11].mxu1  ;;  %v1036_v26 = vmul.f32 %v1031_v8, %v940_v21 }
 0xa32   :  { %v1013_v23 = vpop.f32.mrb[12].mxu1 }
 0xa33   :  { %v1037_v24 = vmul.f32 %v1035_v6, %v1013_v23  ;;  %v1354_v25 = vpop.f32.mrb[13].mxu1 }
 0xa35   :  { %v1040_v27 = vrot.slane %v1037_v24, 7 }
 0xa37   :  { %v1042_v28 = vsel %vm1041_vm4, %v1040_v27, %v1036_v26 }
 0xa38   :  { %1364 = vmatmul.mubr.msk.f32.vlgmr.msra.gmra.mrb[14].mxu1 %vm49_vm0, %v1042_v28  ;;  %1045 = vst.msk [vmem:[#allocation2] sm:$0x3] %vm1044_vm5, %v1042_v28 }
 0xb0b   :  { %v1118_v29 = vpop.f32.mrb[14].mxu1 }
 0xb0c   :  { %v1142_v30 = vmul.f32 %v1118_v29, %v1118_v29  ;;  %v1365_v31 = vpop.f32.mrb[15].mxu1  ;;  %v1134_v33 = vmul.f32 %v1132_v32, %v1118_v29  ;;  %v1123_v38 = vsub.f32 %v1118_v29, %v1122_v35 }
 0xb0e   :  { %1144 = vrot.lane.b32.xlu1 %v1142_v30, %s1497_s2  ;;  %v1124_v42 = vmul.f32 %v1123_v38, %v1123_v38 }
 0xb10   :  { %v1125_v44 = vsel %vm1044_vm5, %v1124_v42, 0.0 }
 0xb12   :  { %1136 = vrot.lane.b32.xlu1 %v1134_v33, %s1497_s2  ;;  %s1501_s2 = smov [#allocation2]  }
 0xb13   :  { %s1169_s18 = sshll.u32 %s1501_s2, 4  ;;  %s1170_s18 = int_to_ptr.vmem [resolvable:$true] %s1169_s18 }
 0xb14   :  { %s1471_s17 = scalar_lea.vmem %s1170_s18, 32  ;;  %p1476_p1 = scmp.lt.s32.totalorder %s1170_s18, %s1170_s18 }
 0xb15   :  { %p1472_p0 = scmp.ne.s32.totalorder %s1170_s18, %s1471_s17  ;;  %p1477_p2 = scmp.lt.s32.totalorder %s1471_s17, %s1471_s17 }
 0xb17   :  { %p1478_p3 = por %p1477_p2, %p1476_p1 }
 0xb19   :  { %p1479_p4 = pnand %p1478_p3, %p1472_p0 }
 0xb36   :  { %1152 = vadd.xlane.f32.xlu1 %v1151_v34 }
 0xb80   :  { %v1145_v36 = vpop.permute.xlu1 %1144 }
 0xb81   :  { %v1147_v37 = vsel %vm1044_vm5, %v1145_v36, 0.0 }
 0xb82   :  { %1148 = vadd.xlane.f32.xlu0 %v1147_v37 }
 0xb84   :  { %v1137_v39 = vpop.permute.xlu1 %1136 }
 0xb85   :  { %v1139_v40 = vsel %vm1044_vm5, %v1137_v39, 0.0 }
 0xb86   :  { %1140 = vadd.xlane.f32.xlu0 %v1139_v40 }
 0xb8a   :  { %1126 = vadd.xlane.f32.xlu0 %v1125_v44 }
 0xb8b   :  { %1482 = shalt.err (!%p1479_p4)
}
 0xb8c   :  { %s1483_s19 = scalar_lea.hbm %s1823_s11, 32 }
 0xb8d   :  { %p1484_p5 = scmp.ne.s32.totalorder %s1823_s11, %s1483_s19  ;;  %p1487_p6 = scmp.lt.u32.totalorder %s1483_s19, %s1823_s11 }
 0xb8f   :  { %p1489_p7 = pnand %p1487_p6, %p1484_p5 }
 0xb91   :  { %1492 = shalt.err (!%p1489_p7)
}
 0xb92   :  { %1172 = dma.vmem_to_hbm [thread:$0]  %s1170_s18, 32, %s1823_s11, [#allocation3]   ;;  %vm1159_vm6 = vcmask 7168   ;;  %vm1161_vm7 = vcmask 9216  }
 0xbc3   :  { %v1153_v45 = vpop.xlane.xlu1 %1152 }
 0xc0f   :  { %v1149_v46 = vpop.xlane.xlu0 %1148 }
 0xc10   :  { %v1154_v47 = vmul.f32 %v1153_v45, %v1149_v46 }
 0xc12   :  { %v1155_v48 = vadd.f32 1e-12, %v1154_v47 }
 0xc13   :  { %v1141_v49 = vpop.xlane.xlu0 %1140 }
 0xc14   :  { %1469 = vrsqrt.f32 %v1155_v48 }
 0xc17   :  { %v1127_v41 = vpop.xlane.xlu0 %1126 }
 0xc18   :  { %v1128_v52 = vmul.f32 0.03125, %v1127_v41 }
 0xc1e   :  { %v1470_v50 = vpop.eup %1469 }
 0xc1f   :  { %v1157_v43 = vmul.f32 %v1470_v50, %v1141_v49 }
 0xc21   :  { %v1158_v51 = vsub.f32 1.0, %v1157_v43 }
 0xc23   :  { %v1160_v53 = vsel %vm1159_vm6, %v1128_v52, %v1158_v51 }
 0xc24   :  { %1162 = vst.msk [vmem:[%s1824_s12] sm:$0x3] %vm1161_vm7, %v1160_v53 }
 0xc25   :  { %1493 = dma.done.wait [#allocation3], 32  }
 0xc26   :  { %1494 = vsyncadd [#allocation3], 4294967264 }
 0xc27   :  { %1180 = vsyncpa [#allocation3], 1 }

</bundles_post_ra>
